<compile_context>
chip_gen: v5e
topology: v5e:2x2
jax: 0.10.0
libtpu: 0.0.40
codegen_flags: <defaults>
</compile_context>

<pallas_src>
import jax
import jax.numpy as jnp
from jax.experimental import pallas as pl
from jax.experimental.pallas import tpu as pltpu


# ----------------------------------------------------------------------------
# Kernel 1: one GCN layer,  out = relu(A_hat @ (feat @ W) + b)
# grid = (num_row_blocks, num_k_blocks); axis 0 parallel, axis 1 = reduction.
# ----------------------------------------------------------------------------
def gcn_layer_kernel(a_ref, feat_ref, w_ref, b_ref, out_ref):
    k = pl.program_id(1)

    @pl.when(k == 0)
    def _init():
        out_ref[...] = jnp.zeros_like(out_ref)

    # (tk, F_in) @ (F_in, H): tiny, recomputed per block (cheap vs A traffic).
    fw = jnp.dot(feat_ref[...], w_ref[...], preferred_element_type=jnp.float32)
    # A tile is bf16 (halves HBM bytes); feed MXU bf16 x bf16, accumulate f32.
    out_ref[...] += jnp.dot(a_ref[...], fw.astype(jnp.bfloat16),
                            preferred_element_type=jnp.float32)

    @pl.when(k == pl.num_programs(1) - 1)
    def _finalize():
        out_ref[...] = jnp.maximum(out_ref[...] + b_ref[...], 0.0)


def gcn_layer(a_hat_bf16, feat, w, b, *, tm, tk):
    n_pad = a_hat_bf16.shape[0]
    f_in = feat.shape[1]
    hidden = w.shape[1]
    grid = (n_pad // tm, n_pad // tk)
    return pl.pallas_call(
        gcn_layer_kernel,
        out_shape=jax.ShapeDtypeStruct((n_pad, hidden), jnp.float32),
        grid=grid,
        in_specs=[
            pl.BlockSpec((tm, tk), lambda i, k: (i, k)),        # streamed A_hat tile
            pl.BlockSpec((tk, f_in), lambda i, k: (k, 0)),      # feature slab (k-indexed)
            pl.BlockSpec(w.shape, lambda i, k: (0, 0)),         # resident weight
            pl.BlockSpec(b.shape, lambda i, k: (0, 0)),         # resident bias
        ],
        out_specs=pl.BlockSpec((tm, hidden), lambda i, k: (i, 0)),  # resident accumulator
        compiler_params=pltpu.CompilerParams(
            dimension_semantics=("parallel", "arbitrary"),
            vmem_limit_bytes=32 * 1024 * 1024,
        ),
    )(a_hat_bf16, feat, w, b)


# ----------------------------------------------------------------------------
# Kernel 2: head — global mean pool (P @ H2) + fc1/relu + fc2.  All tiny.
# ----------------------------------------------------------------------------
def head_kernel(p_ref, h2_ref, wf1_ref, bf1_ref, wf2_ref, bf2_ref, out_ref):
    f32 = jnp.float32
    pooled = jnp.dot(p_ref[...], h2_ref[...], preferred_element_type=f32)
    h3 = jnp.dot(pooled, wf1_ref[...], preferred_element_type=f32) + bf1_ref[...]
    h3 = jnp.maximum(h3, 0.0)
    out_ref[...] = (jnp.dot(h3, wf2_ref[...], preferred_element_type=f32)
                    + bf2_ref[...]).astype(out_ref.dtype)


def gnn_head(pool_mat, h2, wf1, bf1, wf2, bf2):
    num_graphs = pool_mat.shape[0]
    out_dim = wf2.shape[1]
    args = (pool_mat, h2, wf1, bf1, wf2, bf2)
    vmem = pl.BlockSpec(memory_space=pltpu.MemorySpace.VMEM)
    return pl.pallas_call(
        head_kernel,
        out_shape=jax.ShapeDtypeStruct((num_graphs, out_dim), jnp.float32),
        in_specs=[vmem] * len(args),
        out_specs=vmem,
    )(*args)


# ----------------------------------------------------------------------------
# Graph-operator construction (cacheable across forward calls).
# ----------------------------------------------------------------------------
def _round_up(x, m):
    return ((x + m - 1) // m) * m


def build_gcn_operators(edge_index, batch, num_nodes, num_graphs, n_pad):
    """Dense normalized adjacency (bf16) and mean-pool matrix (f32), zero-padded to n_pad."""
    src, dst = edge_index[0], edge_index[1]
    A = jnp.zeros((num_nodes, num_nodes), jnp.float32).at[dst, src].add(1.0)
    A = A + jnp.eye(num_nodes, dtype=jnp.float32)            # self-loops
    deg = A.sum(axis=1)
    d_inv_sqrt = jax.lax.rsqrt(deg)
    A_hat = d_inv_sqrt[:, None] * A * d_inv_sqrt[None, :]

    onehot = (batch[None, :] == jnp.arange(num_graphs)[:, None]).astype(jnp.float32)
    counts = jnp.maximum(onehot.sum(axis=1, keepdims=True), 1.0)
    P = onehot / counts

    if n_pad > num_nodes:
        pad = n_pad - num_nodes
        A_hat = jnp.pad(A_hat, ((0, pad), (0, pad)))          # zero rows/cols: safe
        P = jnp.pad(P, ((0, 0), (0, pad)))
    return A_hat.astype(jnp.bfloat16), P


# ----------------------------------------------------------------------------
# Full forward pass.
# ----------------------------------------------------------------------------
def gnn_apply(x, edge_index, batch, params, num_graphs, *, tile=512):
    n = x.shape[0]
    if n <= tile:
        n_pad = n
        tm = tk = n                      # single full-array block
    else:
        n_pad = _round_up(n, tile)       # tile is a multiple of 128 -> layout-legal
        tm = tk = tile

    a_hat, pool_mat = build_gcn_operators(edge_index, batch, n, num_graphs, n_pad)

    xp = x.astype(jnp.float32)
    if n_pad > n:
        xp = jnp.pad(xp, ((0, n_pad - n), (0, 0)))

    h1 = gcn_layer(a_hat, xp, params["w1"], params["b1"], tm=tm, tk=tk)
    h2 = gcn_layer(a_hat, h1, params["w2"], params["b2"], tm=tm, tk=tk)
    return gnn_head(pool_mat, h2,
                    params["wf1"], params["bf1"], params["wf2"], params["bf2"])


if __name__ == "__main__":
    key = jax.random.PRNGKey(0)
    input_dim, hidden_dim, output_dim = 8, 32, 4
    N = 256            # total nodes across the batched graphs
    num_graphs = 2
    E = 1024           # number of directed edges
    TILE = 128         # small tile so the demo exercises a real (2, 2) grid

    ks = jax.random.split(key, 8)
    x = jax.random.normal(ks[0], (N, input_dim), jnp.float32)
    src = jax.random.randint(ks[1], (E,), 0, N)
    dst = jax.random.randint(ks[2], (E,), 0, N)
    edge_index = jnp.stack([src, dst]).astype(jnp.int32)
    batch = (jnp.arange(N) // (N // num_graphs)).astype(jnp.int32)

    def linear_init(k, fan_in, fan_out):
        # matches torch.nn.Linear default: U(-1/sqrt(fan_in), 1/sqrt(fan_in))
        kw, kb = jax.random.split(k)
        bound = 1.0 / jnp.sqrt(jnp.float32(fan_in))
        w = jax.random.uniform(kw, (fan_in, fan_out), jnp.float32, -bound, bound)
        b = jax.random.uniform(kb, (1, fan_out), jnp.float32, -bound, bound)
        return w, b

    w1, b1 = linear_init(ks[3], input_dim, hidden_dim)      # GCNConv1
    w2, b2 = linear_init(ks[4], hidden_dim, hidden_dim)     # GCNConv2
    wf1, bf1 = linear_init(ks[5], hidden_dim, hidden_dim)   # fc1
    wf2, bf2 = linear_init(ks[6], hidden_dim, output_dim)   # fc2
    params = dict(w1=w1, b1=b1, w2=w2, b2=b2,
                  wf1=wf1, bf1=bf1, wf2=wf2, bf2=bf2)

    out = gnn_apply(x, edge_index, batch, params, num_graphs, tile=TILE)
    jax.block_until_ready(out)
    assert out.shape == (num_graphs, output_dim)
    print("KERNEL_OK")
</pallas_src>

<mosaic_0001>
module attributes {stable_mosaic.version = 11 : i64} {
  func.func @gcn_layer_kernel(%arg0: i32, %arg1: i32, %arg2: memref<128x128xbf16, #tpu.memory_space<vmem>>, %arg3: memref<128x8xf32, #tpu.memory_space<vmem>>, %arg4: memref<8x32xf32, #tpu.memory_space<vmem>>, %arg5: memref<1x32xf32, #tpu.memory_space<vmem>>, %arg6: memref<128x32xf32, #tpu.memory_space<vmem>>) attributes {dimension_semantics = [#tpu.dimension_semantics<parallel>, #tpu.dimension_semantics<arbitrary>], iteration_bounds = array<i64: 2, 2>, scalar_prefetch = 0 : i64, scratch_operands = 0 : i64, tpu.core_type = #tpu.core_type<tc>, window_params = [{transform_indices = @transform_0, window_bounds = array<i64: 128, 128>}, {transform_indices = @transform_1, window_bounds = array<i64: 128, 8>}, {pipeline_mode = #tpu.pipeline_mode<synchronous>, transform_indices = @transform_2, window_bounds = array<i64: 8, 32>}, {pipeline_mode = #tpu.pipeline_mode<synchronous>, transform_indices = @transform_3, window_bounds = array<i64: 1, 32>}, {transform_indices = @transform_4, window_bounds = array<i64: 128, 32>}]} {
    %c0_i32 = arith.constant 0 : i32
    %0 = arith.cmpi eq, %arg1, %c0_i32 : i32
    %1 = arith.extui %0 : i1 to i32
    %c0_i32_0 = arith.constant 0 : i32
    %2 = arith.cmpi ne, %1, %c0_i32_0 : i32
    scf.if %2 {
      %cst_12 = arith.constant 0.000000e+00 : f32
      %15 = vector.broadcast %cst_12 : f32 to vector<128x32xf32>
      %c0_13 = arith.constant 0 : index
      %c0_14 = arith.constant 0 : index
      %16 = vector.load %arg6[%c0_13, %c0_14] : memref<128x32xf32, #tpu.memory_space<vmem>>, vector<128x32xf32>
      tpu.vector_store %arg6[%c0_13, %c0_14], %15 {strides = array<i32>} : memref<128x32xf32, #tpu.memory_space<vmem>>, vector<128x32xf32>,
    } else {
    }
    %c0 = arith.constant 0 : index
    %c0_1 = arith.constant 0 : index
    %3 = vector.load %arg3[%c0, %c0_1] : memref<128x8xf32, #tpu.memory_space<vmem>>, vector<128x8xf32>
    %c0_2 = arith.constant 0 : index
    %c0_3 = arith.constant 0 : index
    %4 = vector.load %arg4[%c0_2, %c0_3] : memref<8x32xf32, #tpu.memory_space<vmem>>, vector<8x32xf32>
    %cst = arith.constant dense<0.000000e+00> : vector<128x32xf32>
    %5 = tpu.matmul %3, %4, %cst {dimension_numbers = #tpu.dot_dimension_numbers<[1], [0], [0], [1], [0, 0, 1, 1], [], []>} : vector<128x8xf32>, vector<8x32xf32>, vector<128x32xf32> -> vector<128x32xf32>
    %c0_4 = arith.constant 0 : index
    %c0_5 = arith.constant 0 : index
    %6 = vector.load %arg6[%c0_4, %c0_5] : memref<128x32xf32, #tpu.memory_space<vmem>>, vector<128x32xf32>
    %c0_6 = arith.constant 0 : index
    %c0_7 = arith.constant 0 : index
    %7 = vector.load %arg2[%c0_6, %c0_7] : memref<128x128xbf16, #tpu.memory_space<vmem>>, vector<128x128xbf16>
    %8 = arith.truncf %5 : vector<128x32xf32> to vector<128x32xbf16>
    %cst_8 = arith.constant dense<0.000000e+00> : vector<128x32xf32>
    %9 = tpu.matmul %7, %8, %cst_8 {dimension_numbers = #tpu.dot_dimension_numbers<[1], [0], [0], [1], [0, 0, 1, 1], [], []>} : vector<128x128xbf16>, vector<128x32xbf16>, vector<128x32xf32> -> vector<128x32xf32>
    %10 = arith.addf %6, %9 : vector<128x32xf32>
    %c0_9 = arith.constant 0 : index
    %c0_10 = arith.constant 0 : index
    %11 = vector.load %arg6[%c0_9, %c0_10] : memref<128x32xf32, #tpu.memory_space<vmem>>, vector<128x32xf32>
    tpu.vector_store %arg6[%c0_9, %c0_10], %10 {strides = array<i32>} : memref<128x32xf32, #tpu.memory_space<vmem>>, vector<128x32xf32>,
    %c1_i32 = arith.constant 1 : i32
    %12 = arith.cmpi eq, %arg1, %c1_i32 : i32
    %13 = arith.extui %12 : i1 to i32
    %c0_i32_11 = arith.constant 0 : i32
    %14 = arith.cmpi ne, %13, %c0_i32_11 : i32
    scf.if %14 {
      %c0_12 = arith.constant 0 : index
      %c0_13 = arith.constant 0 : index
      %15 = vector.load %arg6[%c0_12, %c0_13] : memref<128x32xf32, #tpu.memory_space<vmem>>, vector<128x32xf32>
      %c0_14 = arith.constant 0 : index
      %c0_15 = arith.constant 0 : index
      %16 = vector.load %arg5[%c0_14, %c0_15] : memref<1x32xf32, #tpu.memory_space<vmem>>, vector<1x32xf32>
      %17 = vector.broadcast %16 : vector<1x32xf32> to vector<128x32xf32>
      %18 = arith.addf %15, %17 : vector<128x32xf32>
      %cst_16 = arith.constant 0.000000e+00 : f32
      %19 = vector.broadcast %cst_16 : f32 to vector<128x32xf32>
      %20 = arith.maximumf %18, %19 : vector<128x32xf32>
      %c0_17 = arith.constant 0 : index
      %c0_18 = arith.constant 0 : index
      %21 = vector.load %arg6[%c0_17, %c0_18] : memref<128x32xf32, #tpu.memory_space<vmem>>, vector<128x32xf32>
      tpu.vector_store %arg6[%c0_17, %c0_18], %20 {strides = array<i32>} : memref<128x32xf32, #tpu.memory_space<vmem>>, vector<128x32xf32>,
    } else {
    }
    return
  }
  func.func @transform_0(%arg0: i32, %arg1: i32) -> (i32, i32) {
    %c0_i32 = arith.constant 0 : i32
    return %arg0, %arg1 : i32, i32
  }
  func.func @transform_1(%arg0: i32, %arg1: i32) -> (i32, i32) {
    %c0_i32 = arith.constant 0 : i32
    %c0_i32_0 = arith.constant 0 : i32
    return %arg1, %c0_i32 : i32, i32
  }
  func.func @transform_2(%arg0: i32, %arg1: i32) -> (i32, i32) {
    %c0_i32 = arith.constant 0 : i32
    %c0_i32_0 = arith.constant 0 : i32
    %c0_i32_1 = arith.constant 0 : i32
    return %c0_i32, %c0_i32_0 : i32, i32
  }
  func.func @transform_3(%arg0: i32, %arg1: i32) -> (i32, i32) {
    %c0_i32 = arith.constant 0 : i32
    %c0_i32_0 = arith.constant 0 : i32
    %c0_i32_1 = arith.constant 0 : i32
    return %c0_i32, %c0_i32_0 : i32, i32
  }
  func.func @transform_4(%arg0: i32, %arg1: i32) -> (i32, i32) {
    %c0_i32 = arith.constant 0 : i32
    %c0_i32_0 = arith.constant 0 : i32
    return %arg0, %c0_i32 : i32, i32
  }
}

</mosaic_0001>

<bundles_post_ra>
// kernel: tpu_custom_call.1
= control target key start
LH: loop header
LB: loop body
LE: loop exit
PB: predicated region body
PF: predicated region fallthrough
CT: control target
= control target key end

     0   :  { %s1056_s15 = smov 0   ;;  %s1058_s16 = smov 0   ;;  %s1348_s0 = inlined_call_operand.vmem [shape: bf16[256,256], index: 0, kind: input, shape index: {}]   ;;  %s1349_s1 = inlined_call_operand.vmem [shape: f32[256,8], index: 1, kind: input, shape index: {}]   ;;  %s1350_s2 = inlined_call_operand.vmem [shape: f32[8,32], index: 2, kind: input, shape index: {}]   ;;  %s1351_s3 = inlined_call_operand.vmem [shape: f32[1,32], index: 3, kind: input, shape index: {}]   ;;  %s1352_s4 = inlined_call_operand.vmem [shape: f32[256,32], index: 4, kind: output, shape index: {}]  }
   0x1   :  { %s1060_s17 = smov 0   ;;  %s1062_s18 = smov 0  }
   0x2   :  { %s1064_s19 = smov 0   ;;  %s1066_s20 = smov 0  }
   0x3   :  { %s1068_s21 = smov 0  }
   0x4 LB: > { %s23_s22 = sadd.s32 1, %s1020_s19  ;;  %s26_s23 = sadd.s32 1, %s1024_s20  ;;  %s1028_s21 = sphi %s1068_s21, %s14_s21   ;;  %s1024_s20 = sphi %s1066_s20, %s1358_s20   ;;  %s1020_s19 = sphi %s1064_s19, %s1357_s19   ;;  %s1016_s18 = sphi %s1062_s18, %s1356_s18   ;;  %s1012_s17 = sphi %s1060_s17, %s1355_s17   ;;  %s1008_s16 = sphi %s1058_s16, %s1354_s16   ;;  %s1004_s15 = sphi %s1056_s15, %s1353_s15  }
   0x5   : > { %p24_p0 = scmp.ge.s32.totalorder %s23_s22, 2  ;;  %p42_p1 = scmp.ne.s32.totalorder %s1008_s16, %s1004_s15 }
   0x6   : > { %p43_p2 = scmp.eq.s32.totalorder %s1028_s21, 0  ;;  %s35_s27 = sadd.s32 1, %s1008_s16 }
   0x7   : > { %s1360_s22 = smov (%p24_p0, %s23_s22), 0  ;;  %s1362_s23 = smov (!%p24_p0, %s26_s23), %s1024_s20 }
   0x8   : > { %p44_p3 = por %p43_p2, %p42_p1  ;;  %p28_p4 = scmp.ge.s32.totalorder %s1362_s23, 2 }
   0x9   : > { %s31_s24 = ssub.s32 %s1020_s19, %s1360_s22  ;;  %p827_p6 = scmp.ge.s32.totalorder %s1028_s21, 4 }
   0xa   : > { %s1364_s23 = smov (%p28_p4, %s1362_s23), 0 }
   0xb   : > { %s30_s25 = ssub.s32 %s1024_s20, %s1364_s23  ;;  %168 = sbr.rel (%p827_p6) target bundleno = 38 (0x26), region = 24 }
   0xc   : > { %s32_s26 = sor.u32 %s31_s24, %s30_s25 }
   0xd   : > { %p33_p5 = scmp.eq.s32.totalorder %s32_s26, 0 }
   0xf   : > { %s1107_s28 = scalar_select %p33_p5, %s1008_s16, %s35_s27  }
  0x10   : > { %171 = sbr.rel (!%p44_p3) target bundleno = 38 (0x26), region = 28  ;;  %s173_s29 = sand.u32 (%p44_p3), 1, %s1008_s16  }
  0x11   : > { %s890_s30 = sshll.u32 (%p44_p3), %s1024_s20, 5  ;;  %s828_s5 = sshll.u32 (%p44_p3), %s173_s29, 6 }
  0x12   : > { %s178_s6 = sadd.s32 (%p44_p3), %s1020_s19, %s890_s30  ;;  %s175_s11 = scalar_lea.vmem (%p44_p3), [#allocation2], %s828_s5 }
  0x13   : > { %s831_s7 = sshll.u32 (%p44_p3), %s178_s6, 2 }
  0x14   : > { %s1116_s10 = scalar_lea.vmem (%p44_p3), %s1348_s0, %s831_s7 }
  0x15   : > { %v197_v0 = vld [vmem:[%s1116_s10] sm:$0xf]  ;;  %v199_v1 = vld [vmem:[%s1116_s10 + $0x8] sm:$0xf]  ;;  %v201_v2 = vld [vmem:[%s1116_s10 + $0x10] sm:$0xf] }
  0x16   : > { %198 = vst [vmem:[%s175_s11] sm:$0xf] %v197_v0  ;;  %v203_v3 = vld [vmem:[%s1116_s10 + $0x18] sm:$0xf]  ;;  %v205_v4 = vld [vmem:[%s1116_s10 + $0x20] sm:$0xf] }
  0x17   : > { %200 = vst [vmem:[%s175_s11 + $0x4] sm:$0xf] %v199_v1  ;;  %v207_v5 = vld [vmem:[%s1116_s10 + $0x28] sm:$0xf]  ;;  %v209_v6 = vld [vmem:[%s1116_s10 + $0x30] sm:$0xf] }
  0x18   : > { %202 = vst [vmem:[%s175_s11 + $0x8] sm:$0xf] %v201_v2  ;;  %v211_v7 = vld [vmem:[%s1116_s10 + $0x38] sm:$0xf]  ;;  %v213_v8 = vld [vmem:[%s1116_s10 + $0x40] sm:$0xf] }
  0x19   : > { %204 = vst [vmem:[%s175_s11 + $0xc] sm:$0xf] %v203_v3  ;;  %v215_v9 = vld [vmem:[%s1116_s10 + $0x48] sm:$0xf]  ;;  %v217_v10 = vld [vmem:[%s1116_s10 + $0x50] sm:$0xf] }
  0x1a   : > { %206 = vst [vmem:[%s175_s11 + $0x10] sm:$0xf] %v205_v4  ;;  %v219_v11 = vld [vmem:[%s1116_s10 + $0x58] sm:$0xf]  ;;  %v221_v12 = vld [vmem:[%s1116_s10 + $0x60] sm:$0xf] }
  0x1b   : > { %208 = vst [vmem:[%s175_s11 + $0x14] sm:$0xf] %v207_v5  ;;  %v223_v13 = vld [vmem:[%s1116_s10 + $0x68] sm:$0xf]  ;;  %v225_v14 = vld [vmem:[%s1116_s10 + $0x70] sm:$0xf] }
  0x1c   : > { %210 = vst [vmem:[%s175_s11 + $0x18] sm:$0xf] %v209_v6  ;;  %v227_v15 = vld [vmem:[%s1116_s10 + $0x78] sm:$0xf] }
  0x1d   : > { %212 = vst [vmem:[%s175_s11 + $0x1c] sm:$0xf] %v211_v7 }
  0x1e   : > { %214 = vst [vmem:[%s175_s11 + $0x20] sm:$0xf] %v213_v8 }
  0x1f   : > { %216 = vst [vmem:[%s175_s11 + $0x24] sm:$0xf] %v215_v9 }
  0x20   : > { %218 = vst [vmem:[%s175_s11 + $0x28] sm:$0xf] %v217_v10 }
  0x21   : > { %220 = vst [vmem:[%s175_s11 + $0x2c] sm:$0xf] %v219_v11 }
  0x22   : > { %222 = vst [vmem:[%s175_s11 + $0x30] sm:$0xf] %v221_v12 }
  0x23   : > { %224 = vst [vmem:[%s175_s11 + $0x34] sm:$0xf] %v223_v13 }
  0x24   : > { %226 = vst [vmem:[%s175_s11 + $0x38] sm:$0xf] %v225_v14 }
  0x25   : > { %228 = vst [vmem:[%s175_s11 + $0x3c] sm:$0xf] %v227_v15 }
  0x26 PF: > { %p832_p7 = scmp.ge.s32.totalorder %s1028_s21, 1  ;;  %p292_p8 = scmp.lt.s32.totalorder %s1028_s21, 5 }
  0x28   : > { %p293_p9 = pnand %p832_p7, %p292_p8 }
  0x29   : > { %s299_s12 = sand.u32 (!%p293_p9), 1, %s1004_s15   ;;  %s834_s13 = sshll.u32 (!%p293_p9), %s1012_s17, 4 }
  0x2a   : > { %296 = sbr.rel (%p293_p9) target bundleno = 506 (0x1fa), region = 73  ;;  %s833_s14 = sshll.u32 (!%p293_p9), %s299_s12, 6 }
  0x2b   : > { %p331_p10 = scmp.lt.s32.totalorder (!%p293_p9), %s834_s13, 31  ;;  %s836_s24 = sshll.u32 (!%p293_p9), %s1016_s18, 4 }
  0x2c   : > { %p337_p11 = scmp.lt.s32.totalorder (!%p293_p9), %s836_s24, 31  ;;  %s1149_s15 = scalar_lea.vmem (!%p293_p9), [#allocation2], %s833_s14 }
  0x2d   : > { %p838_p12 = scmp.ne.s32.totalorder (!%p293_p9), %s1012_s17, 0 }
  0x2f   : > { %s1366_s13 = smov (!%p331_p10, %s834_s13), 31  ;;  %s1368_s24 = smov (!%p337_p11, %s836_s24), 31 }
  0x30   : > { %s835_s25 = sshll.u32 %s1366_s13, 3  ;;  %s837_s30 = sshll.u32 %s1368_s24, 3 }
  0x31   : > { %s1142_s29 = scalar_lea.vmem %s1349_s1, %s835_s25  ;;  %s1147_s7 = scalar_lea.vmem %s1352_s4, %s837_s30 }
  0x32   : > { %345 = sbr.rel (%p838_p12) target bundleno = 72 (0x48), region = 81 }
  0x37   : > { %vm346_vm0 = vcmask 261120   ;;  %v1030_v16 = vmov 0.0  }
  0x38   : > { %347 = vst.msk [vmem:[%s1147_s7] sm:$0xff] %vm346_vm0, %v1030_v16 }
  0x39   : > { %348 = vst.msk [vmem:[%s1147_s7 + $0x8] sm:$0xff] %vm346_vm0, %v1030_v16 }
  0x3a   : > { %349 = vst.msk [vmem:[%s1147_s7 + $0x10] sm:$0xff] %vm346_vm0, %v1030_v16 }
  0x3b   : > { %350 = vst.msk [vmem:[%s1147_s7 + $0x18] sm:$0xff] %vm346_vm0, %v1030_v16 }
  0x3c   : > { %351 = vst.msk [vmem:[%s1147_s7 + $0x20] sm:$0xff] %vm346_vm0, %v1030_v16 }
  0x3d   : > { %352 = vst.msk [vmem:[%s1147_s7 + $0x28] sm:$0xff] %vm346_vm0, %v1030_v16 }
  0x3e   : > { %353 = vst.msk [vmem:[%s1147_s7 + $0x30] sm:$0xff] %vm346_vm0, %v1030_v16 }
  0x3f   : > { %354 = vst.msk [vmem:[%s1147_s7 + $0x38] sm:$0xff] %vm346_vm0, %v1030_v16 }
  0x40   : > { %355 = vst.msk [vmem:[%s1147_s7 + $0x40] sm:$0xff] %vm346_vm0, %v1030_v16 }
  0x41   : > { %356 = vst.msk [vmem:[%s1147_s7 + $0x48] sm:$0xff] %vm346_vm0, %v1030_v16 }
  0x42   : > { %357 = vst.msk [vmem:[%s1147_s7 + $0x50] sm:$0xff] %vm346_vm0, %v1030_v16 }
  0x43   : > { %358 = vst.msk [vmem:[%s1147_s7 + $0x58] sm:$0xff] %vm346_vm0, %v1030_v16 }
  0x44   : > { %359 = vst.msk [vmem:[%s1147_s7 + $0x60] sm:$0xff] %vm346_vm0, %v1030_v16 }
  0x45   : > { %360 = vst.msk [vmem:[%s1147_s7 + $0x68] sm:$0xff] %vm346_vm0, %v1030_v16 }
  0x46   : > { %361 = vst.msk [vmem:[%s1147_s7 + $0x70] sm:$0xff] %vm346_vm0, %v1030_v16 }
  0x47   : > { %362 = vst.msk [vmem:[%s1147_s7 + $0x78] sm:$0xff] %vm346_vm0, %v1030_v16 }
  0x48 PF: > { %v379_v17 = vld [vmem:[%s1350_s2] sm:$0xff]  ;;  %vm380_vm1 = vcmask 64512   ;;  %v373_v19 = vld [vmem:[%s1142_s29 + $0x50] sm:$0xff]  ;;  %v364_v20 = vld [vmem:[%s1142_s29 + $0x8] sm:$0xff]  ;;  %vm647_vm2 = vcmask 261120   ;;  %p887_p13 = scmp.ne.s32.totalorder %s1012_s17, 1 }
  0x49   : > { %v363_v18 = vld [vmem:[%s1142_s29] sm:$0xff]  ;;  %444 = vmatpush.msra.mxu0 %v379_v17  ;;  %899 = vmatpush.msra.mxu3 %v379_v17  ;;  %v374_v21 = vld [vmem:[%s1142_s29 + $0x58] sm:$0xff]  ;;  %v365_v22 = vld [vmem:[%s1142_s29 + $0x10] sm:$0xff] }
  0x4a   : > { %839 = vmatmul.msk.f32.vlgmr.msra.gmra.mxu0 %vm380_vm1, %v363_v18  ;;  %849 = vmatmul.msk.f32.vlgmr.msra.gmra.mxu3 %vm380_vm1, %v373_v19  ;;  %v375_v23 = vld [vmem:[%s1142_s29 + $0x60] sm:$0xff]  ;;  %v366_v24 = vld [vmem:[%s1142_s29 + $0x18] sm:$0xff]  ;;  %v376_v25 = vld [vmem:[%s1142_s29 + $0x68] sm:$0xff] }
  0x4b   : > { %v367_v26 = vld [vmem:[%s1142_s29 + $0x20] sm:$0xff]  ;;  %v377_v27 = vld [vmem:[%s1142_s29 + $0x70] sm:$0xff]  ;;  %v368_v28 = vld [vmem:[%s1142_s29 + $0x28] sm:$0xff] }
  0x4c   : > { %v378_v29 = vld [vmem:[%s1142_s29 + $0x78] sm:$0xff]  ;;  %v369_v30 = vld [vmem:[%s1142_s29 + $0x30] sm:$0xff]  ;;  %v371_v32 = vld [vmem:[%s1142_s29 + $0x40] sm:$0xff] }
  0x4d   : > { %v370_v31 = vld [vmem:[%s1142_s29 + $0x38] sm:$0xff]  ;;  %v372_v33 = vld [vmem:[%s1142_s29 + $0x48] sm:$0xff]  ;;  %v891_v59 = vld [vmem:[%s1149_s15] sm:$0xff] }
  0x4e   : > { %v894_v58 = vld [vmem:[%s1149_s15 + $0x18] sm:$0xff]  ;;  %v895_v61 = vld [vmem:[%s1149_s15 + $0x20] sm:$0xff]  ;;  %v892_v62 = vld [vmem:[%s1149_s15 + $0x8] sm:$0xff] }
  0x4f   : > { %v898_v60 = vld [vmem:[%s1149_s15 + $0x38] sm:$0xff]  ;;  %v896_v63 = vld [vmem:[%s1149_s15 + $0x28] sm:$0xff]  ;;  %v893_v0 = vld [vmem:[%s1149_s15 + $0x10] sm:$0xff] }
  0x50   : > { %v897_v1 = vld [vmem:[%s1149_s15 + $0x30] sm:$0xff]  ;;  %v494_v2 = vld [vmem:[%s1147_s7] sm:$0xff]  ;;  %v495_v7 = vld [vmem:[%s1147_s7 + $0x8] sm:$0xff] }
  0x51   : > { %v500_v5 = vld [vmem:[%s1147_s7 + $0x30] sm:$0xff]  ;;  %v501_v11 = vld [vmem:[%s1147_s7 + $0x38] sm:$0xff] }
  0x52   : > { %840 = vmatmul.msk.f32.gmra.mxu0 %vm380_vm1, %v364_v20  ;;  %850 = vmatmul.msk.f32.gmra.mxu3 %vm380_vm1, %v374_v21  ;;  %v496_v13 = vld [vmem:[%s1147_s7 + $0x10] sm:$0xff]  ;;  %v502_v20 = vld [vmem:[%s1147_s7 + $0x40] sm:$0xff] }
  0x53   : > { %v508_v18 = vld [vmem:[%s1147_s7 + $0x70] sm:$0xff] }
  0x5a   : > { %841 = vmatmul.msk.f32.gmra.mxu0 %vm380_vm1, %v365_v22  ;;  %851 = vmatmul.msk.f32.gmra.mxu3 %vm380_vm1, %v375_v23  ;;  %v497_v22 = vld [vmem:[%s1147_s7 + $0x18] sm:$0xff] }
  0x62   : > { %842 = vmatmul.msk.f32.gmra.mxu0 %vm380_vm1, %v366_v24  ;;  %852 = vmatmul.msk.f32.gmra.mxu3 %vm380_vm1, %v376_v25  ;;  %v509_v24 = vld [vmem:[%s1147_s7 + $0x78] sm:$0xff] }
  0x6a   : > { %843 = vmatmul.msk.f32.gmra.mxu0 %vm380_vm1, %v367_v26  ;;  %853 = vmatmul.msk.f32.gmra.mxu3 %vm380_vm1, %v377_v27 }
  0x72   : > { %844 = vmatmul.msk.f32.gmra.mxu0 %vm380_vm1, %v368_v28  ;;  %854 = vmatmul.msk.f32.gmra.mxu3 %vm380_vm1, %v378_v29  ;;  %v503_v29 = vld [vmem:[%s1147_s7 + $0x48] sm:$0xff] }
  0x7a   : > { %845 = vmatmul.msk.f32.gmra.mxu0 %vm380_vm1, %v369_v30 }
  0x82   : > { %846 = vmatmul.msk.f32.gmra.mxu0 %vm380_vm1, %v370_v31  ;;  %v498_v31 = vld [vmem:[%s1147_s7 + $0x20] sm:$0xff] }
  0x8a   : > { %847 = vmatmul.msk.f32.gmra.mxu0 %vm380_vm1, %v371_v32 }
  0x92   : > { %848 = vmatmul.msk.f32.gmra.mxu0 %vm380_vm1, %v372_v33 }
  0xc7   : > { %v446_v34 = vpop.f32.mrf.mxu0 }
  0xcd   : > { %v476_v35 = vpop.f32.mrf.mxu3 }
  0xcf   : > { %v449_v36 = vpop.f32.mrf.mxu0 }
  0xd0   : > { %v526_v37 = vpack.c.bf16 %v449_v36, %v446_v34 }
  0xd5   : > { %v479_v38 = vpop.f32.mrf.mxu3 }
  0xd6   : > { %v531_v50 = vpack.c.bf16 %v479_v38, %v476_v35  ;;  %v504_v35 = vld [vmem:[%s1147_s7 + $0x50] sm:$0xff] }
  0xd7   : > { %v452_v39 = vpop.f32.mrf.mxu0 }
  0xdd   : > { %v482_v40 = vpop.f32.mrf.mxu3 }
  0xdf   : > { %v455_v41 = vpop.f32.mrf.mxu0 }
  0xe0   : > { %v527_v57 = vpack.c.bf16 %v455_v41, %v452_v39  ;;  %v505_v41 = vld [vmem:[%s1147_s7 + $0x58] sm:$0xff] }
  0xe5   : > { %v485_v42 = vpop.f32.mrf.mxu3 }
  0xe6   : > { %v532_v49 = vpack.c.bf16 %v485_v42, %v482_v40 }
  0xe7   : > { %v458_v43 = vpop.f32.mrf.mxu0 }
  0xed   : > { %v488_v44 = vpop.f32.mrf.mxu3 }
  0xef   : > { %v461_v45 = vpop.f32.mrf.mxu0 }
  0xf0   : > { %v528_v56 = vpack.c.bf16 %v461_v45, %v458_v43 }
  0xf5   : > { %v491_v46 = vpop.f32.mrf.mxu3 }
  0xf6   : > { %v533_v47 = vpack.c.bf16 %v491_v46, %v488_v44  ;;  %v506_v44 = vld [vmem:[%s1147_s7 + $0x60] sm:$0xff] }
  0xf7   : > { %v464_v48 = vpop.f32.mrf.mxu0 }
  0xf8   : > { %582 = vmatpush.bf16.msra.mxu1 %v533_v47  ;;  %900 = vmatpush.bf16.msra.mxu2 %v533_v47 }
  0xf9   : > { %901 = vmatpush.bf16.msrb.mxu3 %v533_v47  ;;  %v507_v47 = vld [vmem:[%s1147_s7 + $0x68] sm:$0xff] }
  0xfc   : > { %583 = vmatpush.bf16.msra.mxu1 %v532_v49  ;;  %902 = vmatpush.bf16.msra.mxu2 %v532_v49 }
  0xfd   : > { %903 = vmatpush.bf16.msrb.mxu3 %v532_v49 }
  0xff   : > { %v467_v51 = vpop.f32.mrf.mxu0 }
 0x100   : > { %584 = vmatpush.bf16.msra.mxu1 %v531_v50  ;;  %904 = vmatpush.bf16.msra.mxu2 %v531_v50  ;;  %v529_v55 = vpack.c.bf16 %v467_v51, %v464_v48 }
 0x101   : > { %905 = vmatpush.bf16.msrb.mxu3 %v531_v50 }
 0x107   : > { %v470_v52 = vpop.f32.mrf.mxu0 }
 0x10f   : > { %v473_v53 = vpop.f32.mrf.mxu0 }
 0x110   : > { %v530_v54 = vpack.c.bf16 %v473_v53, %v470_v52 }
 0x112   : > { %585 = vmatpush.bf16.msra.mxu1 %v530_v54  ;;  %906 = vmatpush.bf16.msra.mxu2 %v530_v54 }
 0x113   : > { %907 = vmatpush.bf16.msrb.mxu3 %v530_v54 }
 0x116   : > { %586 = vmatpush.bf16.msra.mxu1 %v529_v55  ;;  %908 = vmatpush.bf16.msra.mxu2 %v529_v55 }
 0x117   : > { %909 = vmatpush.bf16.msrb.mxu3 %v529_v55 }
 0x11a   : > { %587 = vmatpush.bf16.msra.mxu1 %v528_v56  ;;  %910 = vmatpush.bf16.msra.mxu2 %v528_v56 }
 0x11b   : > { %911 = vmatpush.bf16.msrb.mxu3 %v528_v56 }
 0x11e   : > { %588 = vmatpush.bf16.msra.mxu1 %v527_v57  ;;  %912 = vmatpush.bf16.msra.mxu2 %v527_v57 }
 0x11f   : > { %913 = vmatpush.bf16.msrb.mxu3 %v527_v57 }
 0x122   : > { %589 = vmatpush.bf16.msra.mxu1 %v526_v37  ;;  %914 = vmatpush.bf16.msra.mxu2 %v526_v37 }
 0x123   : > { %915 = vmatpush.bf16.msrb.mxu3 %v526_v37  ;;  %v499_v37 = vld [vmem:[%s1147_s7 + $0x28] sm:$0xff] }
 0x125   : > { %605 = vmatmul.bf16.vlgmr.msra.gmra.mxu2 %v894_v58  ;;  %590 = vmatmul.bf16.vlgmr.msra.gmra.mxu1 %v891_v59 }
 0x126   : > { %625 = vmatmul.bf16.vlgmr.msrb.gmra.mxu3 %v898_v60 }
 0x135   : > { %610 = vmatmul.bf16.gmra.mxu2 %v895_v61  ;;  %595 = vmatmul.bf16.gmra.mxu1 %v892_v62 }
 0x145   : > { %615 = vmatmul.bf16.gmra.mxu2 %v896_v63  ;;  %600 = vmatmul.bf16.gmra.mxu1 %v893_v0 }
 0x155   : > { %620 = vmatmul.bf16.gmra.mxu2 %v897_v1 }
 0x1a2   : > { %v591_v3 = vpop.f32.mrf.mxu1 }
 0x1a3   : > { %v631_v4 = vadd.f32 %v591_v3, %v494_v2 }
 0x1a5   : > { %648 = vst.msk [vmem:[%s1147_s7] sm:$0xff] %vm647_vm2, %v631_v4 }
 0x1a8   : > { %v606_v6 = vpop.f32.mrf.mxu2 }
 0x1a9   : > { %v637_v8 = vadd.f32 %v606_v6, %v500_v5  ;;  %v626_v15 = vpop.f32.mrf.mxu3 }
 0x1aa   : > { %v593_v9 = vpop.f32.mrf.mxu1  ;;  %v645_v19 = vadd.f32 %v626_v15, %v508_v18 }
 0x1ab   : > { %654 = vst.msk [vmem:[%s1147_s7 + $0x30] sm:$0xff] %vm647_vm2, %v637_v8  ;;  %v632_v10 = vadd.f32 %v593_v9, %v495_v7 }
 0x1ac   : > { %662 = vst.msk [vmem:[%s1147_s7 + $0x70] sm:$0xff] %vm647_vm2, %v645_v19 }
 0x1ad   : > { %649 = vst.msk [vmem:[%s1147_s7 + $0x8] sm:$0xff] %vm647_vm2, %v632_v10 }
 0x1b0   : > { %v608_v12 = vpop.f32.mrf.mxu2 }
 0x1b1   : > { %v638_v14 = vadd.f32 %v608_v12, %v501_v11  ;;  %v628_v25 = vpop.f32.mrf.mxu3 }
 0x1b2   : > { %v596_v16 = vpop.f32.mrf.mxu1  ;;  %v646_v27 = vadd.f32 %v628_v25, %v509_v24 }
 0x1b3   : > { %655 = vst.msk [vmem:[%s1147_s7 + $0x38] sm:$0xff] %vm647_vm2, %v638_v14  ;;  %v633_v17 = vadd.f32 %v596_v16, %v496_v13 }
 0x1b4   : > { %663 = vst.msk [vmem:[%s1147_s7 + $0x78] sm:$0xff] %vm647_vm2, %v646_v27 }
 0x1b5   : > { %650 = vst.msk [vmem:[%s1147_s7 + $0x10] sm:$0xff] %vm647_vm2, %v633_v17 }
 0x1b8   : > { %v611_v21 = vpop.f32.mrf.mxu2 }
 0x1b9   : > { %v639_v23 = vadd.f32 %v611_v21, %v502_v20 }
 0x1ba   : > { %v598_v26 = vpop.f32.mrf.mxu1 }
 0x1bb   : > { %656 = vst.msk [vmem:[%s1147_s7 + $0x40] sm:$0xff] %vm647_vm2, %v639_v23  ;;  %v634_v28 = vadd.f32 %v598_v26, %v497_v22 }
 0x1bd   : > { %651 = vst.msk [vmem:[%s1147_s7 + $0x18] sm:$0xff] %vm647_vm2, %v634_v28 }
 0x1c0   : > { %v613_v30 = vpop.f32.mrf.mxu2 }
 0x1c1   : > { %v640_v32 = vadd.f32 %v613_v30, %v503_v29 }
 0x1c2   : > { %v601_v33 = vpop.f32.mrf.mxu1 }
 0x1c3   : > { %657 = vst.msk [vmem:[%s1147_s7 + $0x48] sm:$0xff] %vm647_vm2, %v640_v32  ;;  %v635_v34 = vadd.f32 %v601_v33, %v498_v31 }
 0x1c5   : > { %652 = vst.msk [vmem:[%s1147_s7 + $0x20] sm:$0xff] %vm647_vm2, %v635_v34 }
 0x1c8   : > { %v616_v36 = vpop.f32.mrf.mxu2 }
 0x1c9   : > { %v641_v38 = vadd.f32 %v616_v36, %v504_v35 }
 0x1ca   : > { %v603_v39 = vpop.f32.mrf.mxu1 }
 0x1cb   : > { %658 = vst.msk [vmem:[%s1147_s7 + $0x50] sm:$0xff] %vm647_vm2, %v641_v38  ;;  %v636_v40 = vadd.f32 %v603_v39, %v499_v37 }
 0x1cd   : > { %653 = vst.msk [vmem:[%s1147_s7 + $0x28] sm:$0xff] %vm647_vm2, %v636_v40 }
 0x1d0   : > { %v618_v42 = vpop.f32.mrf.mxu2 }
 0x1d1   : > { %v642_v43 = vadd.f32 %v618_v42, %v505_v41 }
 0x1d3   : > { %659 = vst.msk [vmem:[%s1147_s7 + $0x58] sm:$0xff] %vm647_vm2, %v642_v43 }
 0x1d8   : > { %v621_v45 = vpop.f32.mrf.mxu2 }
 0x1d9   : > { %v643_v46 = vadd.f32 %v621_v45, %v506_v44 }
 0x1db   : > { %660 = vst.msk [vmem:[%s1147_s7 + $0x60] sm:$0xff] %vm647_vm2, %v643_v46 }
 0x1df   : > { %667 = sbr.rel (%p887_p13) target bundleno = 506 (0x1fa), region = 85 }
 0x1e0   : > { %v623_v48 = vpop.f32.mrf.mxu2 }
 0x1e1   : > { %v644_v49 = vadd.f32 %v623_v48, %v507_v47 }
 0x1e3   : > { %661 = vst.msk [vmem:[%s1147_s7 + $0x68] sm:$0xff] %vm647_vm2, %v644_v49 }
 0x1e4   : > { %v668_v50 = vld [vmem:[%s1147_s7] sm:$0xff]  ;;  %v669_v52 = vld [vmem:[%s1147_s7 + $0x8] sm:$0xff]  ;;  %v670_v53 = vld [vmem:[%s1147_s7 + $0x10] sm:$0xff] }
 0x1e5   : > { %v973_v51 = vld [vmem:[%s1351_s3] ss:$0 sm:$0xff]  ;;  %v671_v54 = vld [vmem:[%s1147_s7 + $0x18] sm:$0xff]  ;;  %v673_v60 = vld [vmem:[%s1147_s7 + $0x28] sm:$0xff] }
 0x1e6   : > { %v688_v55 = vadd.f32 %v973_v51, %v668_v50  ;;  %v689_v56 = vadd.f32 %v973_v51, %v669_v52  ;;  %v690_v57 = vadd.f32 %v973_v51, %v670_v53  ;;  %v691_v58 = vadd.f32 %v973_v51, %v671_v54  ;;  %v672_v59 = vld [vmem:[%s1147_s7 + $0x20] sm:$0xff]  ;;  %v674_v61 = vld [vmem:[%s1147_s7 + $0x30] sm:$0xff]  ;;  %v675_v0 = vld [vmem:[%s1147_s7 + $0x38] sm:$0xff] }
 0x1e7   : > { %v692_v62 = vadd.f32 %v973_v51, %v672_v59  ;;  %v693_v63 = vadd.f32 %v973_v51, %v673_v60  ;;  %v676_v1 = vld [vmem:[%s1147_s7 + $0x40] sm:$0xff]  ;;  %v694_v5 = vadd.f32 %v973_v51, %v674_v61  ;;  %v677_v6 = vld [vmem:[%s1147_s7 + $0x48] sm:$0xff]  ;;  %v695_v8 = vadd.f32 %v973_v51, %v675_v0  ;;  %v678_v9 = vld [vmem:[%s1147_s7 + $0x50] sm:$0xff] }
 0x1e8   : > { %v704_v2 = vmax.f32 %v688_v55, 0.0  ;;  %v705_v3 = vmax.f32 %v689_v56, 0.0  ;;  %v706_v4 = vmax.f32 %v690_v57, 0.0  ;;  %v707_v7 = vmax.f32 %v691_v58, 0.0  ;;  %v679_v12 = vld [vmem:[%s1147_s7 + $0x58] sm:$0xff]  ;;  %v680_v15 = vld [vmem:[%s1147_s7 + $0x60] sm:$0xff] }
 0x1e9   : > { %v708_v10 = vmax.f32 %v692_v62, 0.0  ;;  %v696_v11 = vadd.f32 %v973_v51, %v676_v1  ;;  %v709_v13 = vmax.f32 %v693_v63, 0.0  ;;  %v697_v14 = vadd.f32 %v973_v51, %v677_v6  ;;  %v682_v21 = vld [vmem:[%s1147_s7 + $0x70] sm:$0xff]  ;;  %v683_v24 = vld [vmem:[%s1147_s7 + $0x78] sm:$0xff] }
 0x1ea   : > { %720 = vst.msk [vmem:[%s1147_s7] sm:$0xff] %vm647_vm2, %v704_v2  ;;  %v710_v16 = vmax.f32 %v694_v5, 0.0  ;;  %v698_v17 = vadd.f32 %v973_v51, %v678_v9  ;;  %v681_v18 = vld [vmem:[%s1147_s7 + $0x68] sm:$0xff]  ;;  %v711_v19 = vmax.f32 %v695_v8, 0.0  ;;  %v699_v20 = vadd.f32 %v973_v51, %v679_v12 }
 0x1eb   : > { %721 = vst.msk [vmem:[%s1147_s7 + $0x8] sm:$0xff] %vm647_vm2, %v705_v3  ;;  %v712_v22 = vmax.f32 %v696_v11, 0.0  ;;  %v700_v23 = vadd.f32 %v973_v51, %v680_v15  ;;  %v713_v25 = vmax.f32 %v697_v14, 0.0  ;;  %v701_v26 = vadd.f32 %v973_v51, %v681_v18 }
 0x1ec   : > { %722 = vst.msk [vmem:[%s1147_s7 + $0x10] sm:$0xff] %vm647_vm2, %v706_v4  ;;  %v714_v27 = vmax.f32 %v698_v17, 0.0  ;;  %v702_v28 = vadd.f32 %v973_v51, %v682_v21  ;;  %v715_v29 = vmax.f32 %v699_v20, 0.0  ;;  %v703_v30 = vadd.f32 %v973_v51, %v683_v24 }
 0x1ed   : > { %723 = vst.msk [vmem:[%s1147_s7 + $0x18] sm:$0xff] %vm647_vm2, %v707_v7  ;;  %v716_v31 = vmax.f32 %v700_v23, 0.0  ;;  %v717_v32 = vmax.f32 %v701_v26, 0.0 }
 0x1ee   : > { %724 = vst.msk [vmem:[%s1147_s7 + $0x20] sm:$0xff] %vm647_vm2, %v708_v10  ;;  %v718_v33 = vmax.f32 %v702_v28, 0.0  ;;  %v719_v34 = vmax.f32 %v703_v30, 0.0 }
 0x1ef   : > { %725 = vst.msk [vmem:[%s1147_s7 + $0x28] sm:$0xff] %vm647_vm2, %v709_v13 }
 0x1f0   : > { %726 = vst.msk [vmem:[%s1147_s7 + $0x30] sm:$0xff] %vm647_vm2, %v710_v16 }
 0x1f1   : > { %727 = vst.msk [vmem:[%s1147_s7 + $0x38] sm:$0xff] %vm647_vm2, %v711_v19 }
 0x1f2   : > { %728 = vst.msk [vmem:[%s1147_s7 + $0x40] sm:$0xff] %vm647_vm2, %v712_v22 }
 0x1f3   : > { %729 = vst.msk [vmem:[%s1147_s7 + $0x48] sm:$0xff] %vm647_vm2, %v713_v25 }
 0x1f4   : > { %730 = vst.msk [vmem:[%s1147_s7 + $0x50] sm:$0xff] %vm647_vm2, %v714_v27 }
 0x1f5   : > { %731 = vst.msk [vmem:[%s1147_s7 + $0x58] sm:$0xff] %vm647_vm2, %v715_v29 }
 0x1f6   : > { %732 = vst.msk [vmem:[%s1147_s7 + $0x60] sm:$0xff] %vm647_vm2, %v716_v31 }
 0x1f7   : > { %733 = vst.msk [vmem:[%s1147_s7 + $0x68] sm:$0xff] %vm647_vm2, %v717_v32 }
 0x1f8   : > { %734 = vst.msk [vmem:[%s1147_s7 + $0x70] sm:$0xff] %vm647_vm2, %v718_v33 }
 0x1f9   : > { %735 = vst.msk [vmem:[%s1147_s7 + $0x78] sm:$0xff] %vm647_vm2, %v719_v34 }
 0x1fa PF: > { %s14_s21 = sadd.s32 1, %s1028_s21   ;;  %s1353_s15 = smov %s1008_s16 }
 0x1fb   : > { %p11_p0 = scmp.ge.s32.totalorder %s14_s21, 6   ;;  %s1354_s16 = smov %s1107_s28 }
 0x1fc   : > { %s1355_s17 = smov %s1020_s19  ;;  %s1356_s18 = smov %s1024_s20 }
 0x1fd   : > { %s1357_s19 = smov %s1360_s22  ;;  %s1358_s20 = smov %s1364_s23 }
 0x1fe   :  { %13 = sbr.rel (!%p11_p0) target bundleno = 4 (0x4), region = 123 }

</bundles_post_ra>
